<compile_context>
chip_gen: v6e
topology: v6e:2x2x1
jax: 0.10.0
libtpu: 0.0.40
codegen_flags: <defaults>
</compile_context>

<pallas_src>
import jax
import jax.numpy as jnp
from jax.experimental import pallas as pl
from jax.experimental.pallas import tpu as pltpu

_LANE = 128


def _layernorm_kernel(x_ref, g_ref, b_ref, o_ref, *, eps: float, inv_c: float):
    # x_ref: (1, C, tT), g_ref/b_ref: (1, C, 1), o_ref: (1, C, tT)
    x = x_ref[...].astype(jnp.float32)

    # One-pass statistics over the channel (sublane) axis: both XLU reductions
    # issue back-to-back with no dependency on a full-tile subtract.
    s1 = jnp.sum(x, axis=1, keepdims=True)          # (1, 1, tT)
    s2 = jnp.sum(x * x, axis=1, keepdims=True)      # (1, 1, tT)
    mean = s1 * inv_c
    var = jnp.maximum(s2 * inv_c - mean * mean, 0.0)  # clamp: cancellation safety

    y = (x - mean) * jax.lax.rsqrt(var + eps)        # (1, C, tT)
    y = y * g_ref[...].astype(jnp.float32) + b_ref[...].astype(jnp.float32)
    o_ref[...] = y.astype(o_ref.dtype)


def layer_norm(x, gamma, beta, eps=1e-4, block_t=None):
    """x: (B, C, T); gamma, beta: (C,).  Normalizes over the channel axis."""
    B, C, T = x.shape
    itemsize = x.dtype.itemsize

    # ---- pick the time-tile width (multiple of 128, sized to VMEM budget) ----
    if block_t is None:
        # Double-buffered input + output tiles plus an f32 working copy,
        # kept well under the smallest default scoped VMEM limit (16 MiB, v5e)
        # and comfortably inside v7x's 64 MiB physical VMEM.
        budget_bytes = 8 * 1024 * 1024
        bytes_per_lane = C * (2 * itemsize + 2 * itemsize + 4)  # 2x in, 2x out, f32 tmp
        max_t = max(_LANE, budget_bytes // max(bytes_per_lane, 1))
        block_t = min(2048, (max_t // _LANE) * _LANE)
    # never wider than T rounded up to a lane multiple
    block_t = max(_LANE, min(block_t, pl.cdiv(T, _LANE) * _LANE))

    # ---- pad T so every tile is full (lane-dense stores, no edge masking) ----
    grid_t = pl.cdiv(T, block_t)
    T_pad = grid_t * block_t
    x_in = x if T_pad == T else jnp.pad(x, ((0, 0), (0, 0), (0, T_pad - T)))

    g = gamma.reshape(1, C, 1)
    b = beta.reshape(1, C, 1)

    kernel = lambda xr, gr, br, orf: _layernorm_kernel(
        xr, gr, br, orf, eps=float(eps), inv_c=1.0 / float(C)
    )

    cost = pl.CostEstimate(
        flops=7 * B * C * T_pad,
        transcendentals=B * T_pad,
        bytes_accessed=2 * B * C * T_pad * itemsize + 2 * C * gamma.dtype.itemsize,
    )

    out = pl.pallas_call(
        kernel,
        out_shape=jax.ShapeDtypeStruct((B, C, T_pad), x.dtype),
        grid=(B, grid_t),
        in_specs=[
            pl.BlockSpec((1, C, block_t), lambda i, t: (i, 0, t)),
            pl.BlockSpec((1, C, 1), lambda i, t: (0, 0, 0)),  # resident
            pl.BlockSpec((1, C, 1), lambda i, t: (0, 0, 0)),  # resident
        ],
        out_specs=pl.BlockSpec((1, C, block_t), lambda i, t: (i, 0, t)),
        compiler_params=pltpu.CompilerParams(
            dimension_semantics=("parallel", "parallel"),
            vmem_limit_bytes=32 * 1024 * 1024,
        ),
        cost_estimate=cost,
    )(x_in, g, b)

    return out if T_pad == T else out[:, :, :T]


def layer_norm_ref(x, gamma, beta, eps=1e-4):
    """Pure-JAX reference matching the PyTorch forward exactly."""
    mean = jnp.mean(x, axis=1, keepdims=True)
    var = jnp.mean((x - mean) ** 2, axis=1, keepdims=True)
    y = (x - mean) * jax.lax.rsqrt(var + eps)
    return y * gamma.reshape(1, -1, 1) + beta.reshape(1, -1, 1)


if __name__ == "__main__":
    B, C, T = 2, 4, 16
    key = jax.random.PRNGKey(0)
    x = jax.random.normal(key, (B, C, T), dtype=jnp.float32)

    # Deterministic parameter init, matching nn.Parameter(torch.ones/zeros(channels))
    gamma = jnp.ones((C,), dtype=jnp.float32)
    beta = jnp.zeros((C,), dtype=jnp.float32)

    out = layer_norm(x, gamma, beta, eps=1e-4)
    out = jax.block_until_ready(out)

    ref = layer_norm_ref(x, gamma, beta, eps=1e-4)
    assert out.shape == (B, C, T)
    assert jnp.allclose(out, ref, atol=1e-5, rtol=1e-5)

    print("KERNEL_OK")
</pallas_src>

<mosaic_0001>
module attributes {stable_mosaic.version = 11 : i64} {
  func.func @_lambda_(%arg0: i32, %arg1: i32, %arg2: memref<1x4x128xf32, #tpu.memory_space<vmem>>, %arg3: memref<1x4x1xf32, #tpu.memory_space<vmem>>, %arg4: memref<1x4x1xf32, #tpu.memory_space<vmem>>, %arg5: memref<1x4x128xf32, #tpu.memory_space<vmem>>) attributes {dimension_semantics = [#tpu.dimension_semantics<parallel>, #tpu.dimension_semantics<parallel>], iteration_bounds = array<i64: 2, 1>, scalar_prefetch = 0 : i64, scratch_operands = 0 : i64, tpu.core_type = #tpu.core_type<tc>, window_params = [{transform_indices = @transform_0, window_bounds = array<i64: 1, 4, 128>}, {pipeline_mode = #tpu.pipeline_mode<synchronous>, transform_indices = @transform_1, window_bounds = array<i64: 1, 4, 1>}, {pipeline_mode = #tpu.pipeline_mode<synchronous>, transform_indices = @transform_2, window_bounds = array<i64: 1, 4, 1>}, {transform_indices = @transform_3, window_bounds = array<i64: 1, 4, 128>}]} {
    %c0 = arith.constant 0 : index
    %c0_0 = arith.constant 0 : index
    %c0_1 = arith.constant 0 : index
    %0 = vector.load %arg2[%c0, %c0_0, %c0_1] : memref<1x4x128xf32, #tpu.memory_space<vmem>>, vector<1x4x128xf32>
    %cst = arith.constant dense<0.000000e+00> : vector<1x128xf32>
    %1 = vector.multi_reduction <add>, %0, %cst [1] : vector<1x4x128xf32> to vector<1x128xf32>
    %2 = vector.shape_cast %1 : vector<1x128xf32> to vector<1x1x128xf32>
    %3 = arith.mulf %0, %0 : vector<1x4x128xf32>
    %cst_2 = arith.constant dense<0.000000e+00> : vector<1x128xf32>
    %4 = vector.multi_reduction <add>, %3, %cst_2 [1] : vector<1x4x128xf32> to vector<1x128xf32>
    %5 = vector.shape_cast %4 : vector<1x128xf32> to vector<1x1x128xf32>
    %cst_3 = arith.constant 2.500000e-01 : f32
    %6 = vector.broadcast %cst_3 : f32 to vector<1x1x128xf32>
    %7 = arith.mulf %2, %6 : vector<1x1x128xf32>
    %cst_4 = arith.constant 2.500000e-01 : f32
    %8 = vector.broadcast %cst_4 : f32 to vector<1x1x128xf32>
    %9 = arith.mulf %5, %8 : vector<1x1x128xf32>
    %10 = arith.mulf %7, %7 : vector<1x1x128xf32>
    %11 = arith.subf %9, %10 : vector<1x1x128xf32>
    %cst_5 = arith.constant 0.000000e+00 : f32
    %12 = vector.broadcast %cst_5 : f32 to vector<1x1x128xf32>
    %13 = arith.maximumf %11, %12 : vector<1x1x128xf32>
    %14 = vector.broadcast %7 : vector<1x1x128xf32> to vector<1x4x128xf32>
    %15 = arith.subf %0, %14 : vector<1x4x128xf32>
    %cst_6 = arith.constant 9.99999974E-5 : f32
    %16 = vector.broadcast %cst_6 : f32 to vector<1x1x128xf32>
    %17 = arith.addf %13, %16 : vector<1x1x128xf32>
    %18 = math.rsqrt %17 : vector<1x1x128xf32>
    %19 = vector.broadcast %18 : vector<1x1x128xf32> to vector<1x4x128xf32>
    %20 = arith.mulf %15, %19 : vector<1x4x128xf32>
    %c0_7 = arith.constant 0 : index
    %c0_8 = arith.constant 0 : index
    %c0_9 = arith.constant 0 : index
    %21 = vector.load %arg3[%c0_7, %c0_8, %c0_9] : memref<1x4x1xf32, #tpu.memory_space<vmem>>, vector<1x4x1xf32>
    %22 = vector.broadcast %21 : vector<1x4x1xf32> to vector<1x4x128xf32>
    %23 = arith.mulf %20, %22 : vector<1x4x128xf32>
    %c0_10 = arith.constant 0 : index
    %c0_11 = arith.constant 0 : index
    %c0_12 = arith.constant 0 : index
    %24 = vector.load %arg4[%c0_10, %c0_11, %c0_12] : memref<1x4x1xf32, #tpu.memory_space<vmem>>, vector<1x4x1xf32>
    %25 = vector.broadcast %24 : vector<1x4x1xf32> to vector<1x4x128xf32>
    %26 = arith.addf %23, %25 : vector<1x4x128xf32>
    %c0_13 = arith.constant 0 : index
    %c0_14 = arith.constant 0 : index
    %c0_15 = arith.constant 0 : index
    %27 = vector.load %arg5[%c0_13, %c0_14, %c0_15] : memref<1x4x128xf32, #tpu.memory_space<vmem>>, vector<1x4x128xf32>
    tpu.vector_store %arg5[%c0_13, %c0_14, %c0_15], %26 {strides = array<i32>} : memref<1x4x128xf32, #tpu.memory_space<vmem>>, vector<1x4x128xf32>,
    return
  }
  func.func @transform_0(%arg0: i32, %arg1: i32) -> (i32, i32, i32) {
    %c0_i32 = arith.constant 0 : i32
    %c0_i32_0 = arith.constant 0 : i32
    return %arg0, %c0_i32, %arg1 : i32, i32, i32
  }
  func.func @transform_1(%arg0: i32, %arg1: i32) -> (i32, i32, i32) {
    %c0_i32 = arith.constant 0 : i32
    %c0_i32_0 = arith.constant 0 : i32
    %c0_i32_1 = arith.constant 0 : i32
    %c0_i32_2 = arith.constant 0 : i32
    return %c0_i32, %c0_i32_0, %c0_i32_1 : i32, i32, i32
  }
  func.func @transform_2(%arg0: i32, %arg1: i32) -> (i32, i32, i32) {
    %c0_i32 = arith.constant 0 : i32
    %c0_i32_0 = arith.constant 0 : i32
    %c0_i32_1 = arith.constant 0 : i32
    %c0_i32_2 = arith.constant 0 : i32
    return %c0_i32, %c0_i32_0, %c0_i32_1 : i32, i32, i32
  }
  func.func @transform_3(%arg0: i32, %arg1: i32) -> (i32, i32, i32) {
    %c0_i32 = arith.constant 0 : i32
    %c0_i32_0 = arith.constant 0 : i32
    return %arg0, %c0_i32, %arg1 : i32, i32, i32
  }
}

</mosaic_0001>

<bundles_post_ra>
// kernel: tpu_custom_call.1
= control target key start
LH: loop header
LB: loop body
LE: loop exit
PB: predicated region body
PF: predicated region fallthrough
CT: control target
= control target key end

     0   :  { %8 = vsyncpa [#allocation3], 0  ;;  %s593_s0 = inlined_call_operand.vmem [shape: f32[2,4,128], index: 0, kind: input, shape index: {}]   ;;  %s594_s1 = inlined_call_operand.vmem [shape: f32[1,4,1], index: 1, kind: input, shape index: {}]   ;;  %s595_s2 = inlined_call_operand.vmem [shape: f32[1,4,1], index: 2, kind: input, shape index: {}]   ;;  %s596_s3 = inlined_call_operand.hbm [shape: f32[2,4,128], index: 3, kind: output, shape index: {}]  }
   0x1   :  { %10 = vsyncpa [#allocation3 + $0x1], 0  ;;  %s488_s12 = smov 0   ;;  %s490_s13 = smov 0  }
   0x2   :  { %s492_s14 = smov 0   ;;  %s494_s15 = smov 0  }
   0x3   :  { %s496_s16 = smov 0   ;;  %s498_s17 = smov 0  }
   0x4 LB: > { %s318_s18 = sadd.s32 4294967295, %s464_s17   ;;  %s319_s19 = sadd.s32 4294967294, %s464_s17   ;;  %s464_s17 = sphi %s498_s17, %s16_s17   ;;  %s460_s16 = sphi %s496_s16, %s603_s16   ;;  %s456_s15 = sphi %s494_s15, %s602_s15   ;;  %s452_s14 = sphi %s492_s14, %s601_s14   ;;  %s448_s13 = sphi %s490_s13, %s600_s13   ;;  %s444_s12 = sphi %s488_s12, %s599_s12  }
   0x5   : > { %s28_s20 = sadd.s32 1, %s460_s16  ;;  %s107_s21 = sadd.s32 1, %s452_s14 }
   0x6   : > { %p30_p0 = scmp.ge.s32.totalorder %s28_s20, 2  ;;  %p117_p1 = scmp.ne.s32.totalorder %s452_s14, %s448_s13 }
   0x7   : > { %p118_p2 = scmp.eq.s32.totalorder %s318_s18, 1  ;;  %p123_p3 = scmp.ne.s32.totalorder %s448_s13, %s444_s12 }
   0x8   : > { %s605_s20 = smov (%p30_p0, %s28_s20), 0  ;;  %p124_p5 = scmp.eq.s32.totalorder %s319_s19, 1 }
   0x9   : > { %p528_p4 = por %p118_p2, %p117_p1  ;;  %s102_s23 = ssub.s32 %s460_s16, %s605_s20 }
   0xa   : > { %p322_p6 = scmp.ge.s32.totalorder %s464_s17, 1  ;;  %p105_p7 = scmp.eq.s32.totalorder %s102_s23, 0 }
   0xb   : > { %p535_p8 = por %p124_p5, %p123_p3  ;;  %p158_p9 = scmp.lt.s32.totalorder %s464_s17, 3 }
   0xc   : > { %s541_s25 = scalar_select %p105_p7, %s452_s14, %s107_s21  }
   0xd   : > { %p159_p10 = pnand %p322_p6, %p158_p9 }
   0xe   : > { %p184_p11 = scmp.lt.s32.totalorder (!%p159_p10), %s456_s15, 1  ;;  %s181_s8 = sand.u32 (!%p159_p10), 1, %s448_s13  }
   0xf   : > { %162 = sbr.rel (%p159_p10) target bundleno = 165 (0xa5), region = 32  ;;  %s323_s9 = sshll.u32 (!%p159_p10), %s181_s8, 2 }
  0x10   : > { %s326_s10 = sshll.u32 (!%p159_p10), %s456_s15, 6  ;;  %s183_s11 = scalar_lea.vmem (!%p159_p10), [#allocation2], %s323_s9 }
  0x11   : > { %s247_s18 = sshll.u32 (!%p159_p10), %s183_s11, 4  ;;  %s245_s23 = scalar_lea.hbm (!%p159_p10), %s596_s3, %s326_s10  ;;  %s248_s18 = int_to_ptr.vmem [resolvable:$true] %s247_s18 }
  0x12   : > { %s233_s26 = scalar_lea.sflag (!%p159_p10), [#allocation3], %s181_s8  ;;  %s388_s27 = scalar_lea.vmem (!%p159_p10), %s248_s18, 64 }
  0x13   : > { %p389_p12 = scmp.ne.s32.totalorder (!%p159_p10), %s248_s18, %s388_s27  ;;  %s467_s28 = smov (!%p159_p10), [#allocation2]  }
  0x14   : > { %v217_v0 = vld [vmem:[%s594_s1] sm:$0xf]  ;;  %v466_v1 = vmov 0   ;;  %s185_s30 = scalar_select %p184_p11, %s456_s15, 1  ;;  %vm192_vm0 = vcmask 1043456  }
  0x15   : > { %385 = vset.pattern.permute.xlu0 %v466_v1  ;;  %v224_v2 = vld [vmem:[%s595_s2] sm:$0xf]  ;;  %p390_p13 = pnand %p389_p12, %p528_p4  ;;  %s392_s29 = sshll.u32 %s467_s28, 4  ;;  %s393_s29 = int_to_ptr.vmem [resolvable:$false] %s392_s29 }
  0x16   : > { %220 = vperm.xlu0 %385, %v217_v0   ;;  %s324_s4 = sshll.u32 %s185_s30, 2  ;;  %s394_s15 = scalar_lea.vmem %s393_s29, 128 }
  0x17   : > { %s190_s7 = scalar_lea.vmem %s593_s0, %s324_s4  ;;  %p391_p0 = pneg %p390_p13 }
  0x18   : > { %v191_v3 = vld [vmem:[%s190_s7] sm:$0xf]  ;;  %p395_p1 = scmp.lt.s32.totalorder %s248_s18, %s393_s29  ;;  %p396_p2 = scmp.lt.s32.totalorder %s394_s15, %s388_s27 }
  0x19   : > { %v193_v4 = vsel %vm192_vm0, %v191_v3, 0.0  ;;  %v200_v5 = vmul.f32 %v191_v3, %v191_v3 }
  0x1a   : > { %227 = vperm.xlu0 %385, %v224_v2   ;;  %v194_v6 = vrot.slane %v193_v4, 4  ;;  %p397_p3 = por %p396_p2, %p395_p1 }
  0x1b   : > { %v201_v7 = vsel %vm192_vm0, %v200_v5, 0.0 }
  0x1c   : > { %v195_v8 = vadd.f32 %v194_v6, %v193_v4  ;;  %v202_v9 = vrot.slane %v201_v7, 4  ;;  %p398_p5 = pnand %p397_p3, %p391_p0 }
  0x1e   : > { %v196_v10 = vrot.slane %v195_v8, 2  ;;  %v203_v11 = vadd.f32 %v202_v9, %v201_v7 }
  0x20   : > { %v197_v12 = vadd.f32 %v196_v10, %v195_v8  ;;  %v204_v13 = vrot.slane %v203_v11, 2 }
  0x22   : > { %v198_v14 = vrot.slane %v197_v12, 1  ;;  %v205_v15 = vadd.f32 %v204_v13, %v203_v11 }
  0x24   : > { %v199_v16 = vadd.f32 %v198_v14, %v197_v12  ;;  %v206_v17 = vrot.slane %v205_v15, 1 }
  0x26   : > { %v207_v18 = vadd.f32 %v206_v17, %v205_v15  ;;  %v208_v19 = vmul.f32 0.25, %v199_v16 }
  0x28   : > { %v209_v20 = vmul.f32 0.25, %v207_v18  ;;  %v210_v21 = vmul.f32 %v208_v19, %v208_v19  ;;  %v213_v25 = vsub.f32 %v191_v3, %v208_v19 }
  0x2a   : > { %v211_v22 = vsub.f32 %v209_v20, %v210_v21 }
  0x2c   : > { %v212_v23 = vmax.f32 %v211_v22, 0.0 }
  0x2e   : > { %v214_v24 = vadd.f32 0.0001, %v212_v23 }
  0x30   : > { %386 = vrsqrt.f32 %v214_v24 }
  0x3d   : > { %v387_v26 = vpop.eup %386 }
  0x3e   : > { %v216_v27 = vmul.f32 %v387_v26, %v213_v25 }
  0x91   : > { %v221_v28 = vpop.permute.xlu0 %220 }
  0x92   : > { %v223_v29 = vmul.f32 %v221_v28, %v216_v27 }
  0x95   : > { %v228_v30 = vpop.permute.xlu0 %227 }
  0x96   : > { %v230_v31 = vadd.f32 %v228_v30, %v223_v29 }
  0x98   : > { %231 = vst [vmem:[%s183_s11] sm:$0xf] %v230_v31 }
  0x99   : > { %401 = shalt.err (!%p398_p5)
}
  0x9a   : > { %s402_s30 = scalar_lea.hbm %s245_s23, 64  ;;  %s406_s6 = scalar_lea.hbm %s596_s3, 128 }
  0x9b   : > { %p403_p6 = scmp.ne.s32.totalorder %s245_s23, %s402_s30  ;;  %p407_p10 = scmp.lt.s32.totalorder %s245_s23, %s596_s3 }
  0x9c   : > { %p408_p11 = scmp.lt.s32.totalorder %s406_s6, %s402_s30 }
  0x9d   : > { %p404_p7 = pnand %p403_p6, %p528_p4 }
  0x9e   : > { %p409_p12 = por %p408_p11, %p407_p10 }
  0x9f   : > { %p405_p9 = pneg %p404_p7 }
  0xa1   : > { %p410_p13 = pnand %p409_p12, %p405_p9 }
  0xa3   : > { %413 = shalt.err (!%p410_p13)
}
  0xa4   : > { %329 = dma.vmem_to_hbm [thread:$0]  (%p528_p4), %s248_s18, 64, %s245_s23, %s233_s26  }
  0xa5 PF: > { %p335_p0 = scmp.ge.s32.totalorder %s464_s17, 2  ;;  %s259_s9 = sand.u32 1, %s444_s12  }
  0xa6   : > { %s260_s10 = scalar_lea.sflag [#allocation3], %s259_s9 }
  0xa7   : > { %p332_p1 = pnand %p335_p0, %p535_p8 }
  0xa9   : > { %p333_p2 = pneg %p332_p1 }
  0xab   : > { %439 = dma.done.wait (%p333_p2), %s260_s10, 64  }
  0xac   : > { %441 = vsyncadd (%p333_p2), %s260_s10, 4294967232  ;;  %s16_s17 = sadd.s32 1, %s464_s17   ;;  %s599_s12 = smov %s448_s13 }
  0xad   : > { %p13_p3 = scmp.ge.s32.totalorder %s16_s17, 4   ;;  %s600_s13 = smov %s452_s14 }
  0xae   : > { %s601_s14 = smov %s541_s25  ;;  %s602_s15 = smov %s460_s16 }
  0xaf   : > { %s603_s16 = smov %s605_s20  ;;  %15 = sbr.rel (!%p13_p3) target bundleno = 4 (0x4), region = 67 }
  0xb4   :  { %265 = vsyncpa [#allocation3], 1 }
  0xb5   :  { %267 = vsyncpa [#allocation3 + $0x1], 1 }

</bundles_post_ra>
